<compile_context>
chip_gen: v5e
topology: v5e:2x2
jax: 0.10.0
libtpu: 0.0.40
codegen_flags: <defaults>
</compile_context>

<pallas_src>
import functools

import jax
import jax.numpy as jnp
from jax.experimental import pallas as pl
from jax.experimental.pallas import tpu as pltpu


def _round_up(a, b):
    return (a + b - 1) // b * b


def _logits_tile(x_ref, w1_ref, b1_ref, w2_ref, b2_ref, operand_dtype):
    """fc1 -> ReLU -> fc2 for one row tile.

    MXU operands are `operand_dtype` (bf16 by default); accumulation and all
    elementwise math (bias add, ReLU) are float32.
    """
    h = jnp.dot(x_ref[...], w1_ref[...], preferred_element_type=jnp.float32)
    h = jnp.maximum(h + b1_ref[...], 0.0)
    logits = jnp.dot(h.astype(operand_dtype), w2_ref[...],
                     preferred_element_type=jnp.float32)
    return logits + b2_ref[...]


def _stats_kernel(x_ref, w1_ref, b1_ref, w2_ref, b2_ref, m_ref, s_ref,
                  *, n_rows, row_tile, operand_dtype, mask_last_tile):
    """Pass 1: online per-column (dim=0) running max / sum-of-exp."""
    i = pl.program_id(0)

    @pl.when(i == 0)
    def _():
        m_ref[...] = jnp.full_like(m_ref, -jnp.inf)
        s_ref[...] = jnp.zeros_like(s_ref)

    logits = _logits_tile(x_ref, w1_ref, b1_ref, w2_ref, b2_ref, operand_dtype)

    def update(lg):
        m_old = m_ref[...]
        m_new = jnp.maximum(m_old, jnp.max(lg, axis=0, keepdims=True))
        s_ref[...] = (s_ref[...] * jnp.exp(m_old - m_new)
                      + jnp.sum(jnp.exp(lg - m_new), axis=0, keepdims=True))
        m_ref[...] = m_new

    if mask_last_tile:
        last = pl.num_programs(0) - 1

        @pl.when(i != last)
        def _():
            update(logits)

        @pl.when(i == last)
        def _():
            # Only the last tile contains zero-padded rows; keep them out of
            # the dim-0 statistics (exp(-inf) == 0).
            row = i * row_tile + jax.lax.broadcasted_iota(
                jnp.int32, logits.shape, 0)
            update(jnp.where(row < n_rows, logits, -jnp.inf))
    else:
        update(logits)


def _softmax_kernel(x_ref, w1_ref, b1_ref, w2_ref, b2_ref, m_ref, s_ref,
                    p_ref, *, operand_dtype):
    """Pass 2: recompute logits for this tile and normalize exactly."""
    logits = _logits_tile(x_ref, w1_ref, b1_ref, w2_ref, b2_ref, operand_dtype)
    inv_s = 1.0 / s_ref[...]          # exact; only x_dim divides per tile
    p_ref[...] = (jnp.exp(logits - m_ref[...]) * inv_s).astype(p_ref.dtype)


def softmax_encoder(x, w1, b1, w2, b2, *, row_tile=2048,
                    operand_dtype=jnp.bfloat16):
    """softmax(dim=0)(fc2(relu(fc1(x)))).

    x: (N, item_size); w1: (item_size, H); b1: (H,); w2: (H, X); b2: (X,).
    Weights use the (in_features, out_features) layout (i.e. the transpose of
    torch.nn.Linear.weight).  Returns a float32 (N, X) array.
    """
    n, item_size = x.shape
    hidden_dim = w1.shape[1]
    x_dim = w2.shape[1]

    # Row tile: multiple of 8 sublanes; capped at the (rounded-up) row count.
    tn = min(_round_up(row_tile, 8), _round_up(n, 8))
    num_tiles = pl.cdiv(n, tn)
    np_rows = num_tiles * tn
    needs_pad = np_rows != n

    x_c = x.astype(operand_dtype)
    if needs_pad:
        x_c = jnp.pad(x_c, ((0, np_rows - n), (0, 0)))
    w1_c = w1.astype(operand_dtype)
    w2_c = w2.astype(operand_dtype)
    b1_r = b1.astype(jnp.float32).reshape(1, hidden_dim)
    b2_r = b2.astype(jnp.float32).reshape(1, x_dim)

    # x / p are streamed per row tile; weights, biases and the (1, x_dim)
    # softmax statistics are grid-invariant (VMEM-resident).  Feature dims use
    # their true sizes (block dim == full array dim), no lane padding.
    x_spec = pl.BlockSpec((tn, item_size), lambda i: (i, 0))
    invariant = lambda shape: pl.BlockSpec(shape, lambda i: (0, 0))
    weight_specs = [
        invariant((item_size, hidden_dim)),   # w1 resident
        invariant((1, hidden_dim)),           # b1 resident
        invariant((hidden_dim, x_dim)),       # w2 resident
        invariant((1, x_dim)),                # b2 resident
    ]
    stat_spec = invariant((1, x_dim))

    itemsize = jnp.dtype(operand_dtype).itemsize
    mm_flops = 2 * np_rows * (item_size * hidden_dim + hidden_dim * x_dim)
    x_bytes = np_rows * item_size * itemsize
    w_bytes = ((item_size * hidden_dim + hidden_dim * x_dim) * itemsize
               + (hidden_dim + x_dim) * 4)

    # Pass 1: per-column running max / sum-of-exp (sequential over row tiles;
    # the (1, x_dim) outputs act as VMEM-resident accumulators).
    m, s = pl.pallas_call(
        functools.partial(_stats_kernel, n_rows=n, row_tile=tn,
                          operand_dtype=operand_dtype,
                          mask_last_tile=needs_pad),
        out_shape=(jax.ShapeDtypeStruct((1, x_dim), jnp.float32),
                   jax.ShapeDtypeStruct((1, x_dim), jnp.float32)),
        grid=(num_tiles,),
        in_specs=[x_spec] + weight_specs,
        out_specs=(stat_spec, stat_spec),
        compiler_params=pltpu.CompilerParams(
            dimension_semantics=("arbitrary",)),   # cross-tile dim-0 reduction
        cost_estimate=pl.CostEstimate(
            flops=mm_flops, transcendentals=np_rows * x_dim,
            bytes_accessed=x_bytes + w_bytes + 8 * x_dim),
    )(x_c, w1_c, b1_r, w2_c, b2_r)

    # Pass 2: recompute logits per tile (cheap) and normalize exactly.
    p_padded = pl.pallas_call(
        functools.partial(_softmax_kernel, operand_dtype=operand_dtype),
        out_shape=jax.ShapeDtypeStruct((np_rows, x_dim), jnp.float32),
        grid=(num_tiles,),
        in_specs=[x_spec] + weight_specs + [stat_spec, stat_spec],
        out_specs=pl.BlockSpec((tn, x_dim), lambda i: (i, 0)),
        compiler_params=pltpu.CompilerParams(
            dimension_semantics=("parallel",)),    # independent row tiles
        cost_estimate=pl.CostEstimate(
            flops=mm_flops + 2 * np_rows * x_dim,
            transcendentals=np_rows * x_dim,
            bytes_accessed=x_bytes + w_bytes + 4 * np_rows * x_dim + 8 * x_dim),
    )(x_c, w1_c, b1_r, w2_c, b2_r, m, s)

    return p_padded[:n] if needs_pad else p_padded


def reference(x, w1, b1, w2, b2, operand_dtype=jnp.float32):
    """Pure-JAX reference (optionally with the kernel's operand precision)."""
    h = jnp.dot(x.astype(operand_dtype), w1.astype(operand_dtype),
                preferred_element_type=jnp.float32)
    h = jnp.maximum(h + b1.astype(jnp.float32), 0.0)
    logits = jnp.dot(h.astype(operand_dtype), w2.astype(operand_dtype),
                     preferred_element_type=jnp.float32) + b2.astype(jnp.float32)
    return jax.nn.softmax(logits, axis=0)


if __name__ == "__main__":
    # Small shapes consistent with the module: item_size=16, hidden_dim=32,
    # x_dim=8.  N=200 with row_tile=64 -> 4 row tiles with 56 padded rows in
    # the last tile (exercises the online cross-tile dim-0 reduction and the
    # padded-row masking path).
    N, item_size, hidden_dim, x_dim = 200, 16, 32, 8

    key = jax.random.PRNGKey(0)
    kx, k1, kb1, k2, kb2 = jax.random.split(key, 5)

    x = jax.random.normal(kx, (N, item_size), dtype=jnp.float32)

    # Deterministic parameter init (uniform, like nn.Linear's default range),
    # stored pre-transposed as (in_features, out_features).
    lim1 = 1.0 / (item_size ** 0.5)
    lim2 = 1.0 / (hidden_dim ** 0.5)
    w1 = jax.random.uniform(k1, (item_size, hidden_dim), jnp.float32, -lim1, lim1)
    b1 = jax.random.uniform(kb1, (hidden_dim,), jnp.float32, -lim1, lim1)
    w2 = jax.random.uniform(k2, (hidden_dim, x_dim), jnp.float32, -lim2, lim2)
    b2 = jax.random.uniform(kb2, (x_dim,), jnp.float32, -lim2, lim2)

    p = softmax_encoder(x, w1, b1, w2, b2, row_tile=64)
    p = jax.block_until_ready(p)

    assert p.shape == (N, x_dim)
    assert bool(jnp.all(jnp.isfinite(p)))

    # Kernel vs. a reference using the same bf16 MXU operands / f32 math.
    p_ref_bf16 = reference(x, w1, b1, w2, b2, operand_dtype=jnp.bfloat16)
    assert jnp.allclose(p, p_ref_bf16, atol=1e-3, rtol=1e-2), \
        "mismatch vs same-precision reference"

    # Kernel vs. the full-float32 reference (bf16-operand tolerance).
    p_ref_f32 = reference(x, w1, b1, w2, b2, operand_dtype=jnp.float32)
    assert jnp.allclose(p, p_ref_f32, atol=5e-3, rtol=5e-2), \
        "mismatch vs float32 reference"

    # Softmax over dim=0: every column sums to 1 (exact normalization now).
    assert jnp.allclose(jnp.sum(p, axis=0), jnp.ones((x_dim,)), atol=1e-4)

    print("KERNEL_OK")
</pallas_src>

<mosaic_0001>
module attributes {stable_mosaic.version = 11 : i64} {
  func.func @_stats_kernel(%arg0: i32, %arg1: memref<64x16xbf16, #tpu.memory_space<vmem>>, %arg2: memref<16x32xbf16, #tpu.memory_space<vmem>>, %arg3: memref<1x32xf32, #tpu.memory_space<vmem>>, %arg4: memref<32x8xbf16, #tpu.memory_space<vmem>>, %arg5: memref<1x8xf32, #tpu.memory_space<vmem>>, %arg6: memref<1x8xf32, #tpu.memory_space<vmem>>, %arg7: memref<1x8xf32, #tpu.memory_space<vmem>>) attributes {dimension_semantics = [#tpu.dimension_semantics<arbitrary>], iteration_bounds = array<i64: 4>, scalar_prefetch = 0 : i64, scratch_operands = 0 : i64, tpu.core_type = #tpu.core_type<tc>, window_params = [{transform_indices = @transform_0, window_bounds = array<i64: 64, 16>}, {pipeline_mode = #tpu.pipeline_mode<synchronous>, transform_indices = @transform_1, window_bounds = array<i64: 16, 32>}, {pipeline_mode = #tpu.pipeline_mode<synchronous>, transform_indices = @transform_2, window_bounds = array<i64: 1, 32>}, {pipeline_mode = #tpu.pipeline_mode<synchronous>, transform_indices = @transform_3, window_bounds = array<i64: 32, 8>}, {pipeline_mode = #tpu.pipeline_mode<synchronous>, transform_indices = @transform_4, window_bounds = array<i64: 1, 8>}, {pipeline_mode = #tpu.pipeline_mode<synchronous>, transform_indices = @transform_5, window_bounds = array<i64: 1, 8>}, {pipeline_mode = #tpu.pipeline_mode<synchronous>, transform_indices = @transform_6, window_bounds = array<i64: 1, 8>}]} {
    %c0_i32 = arith.constant 0 : i32
    %0 = arith.cmpi eq, %arg0, %c0_i32 : i32
    %1 = arith.extui %0 : i1 to i32
    %c0_i32_0 = arith.constant 0 : i32
    %2 = arith.cmpi ne, %1, %c0_i32_0 : i32
    scf.if %2 {
      %cst_15 = arith.constant 0xFF800000 : f32
      %23 = vector.broadcast %cst_15 : f32 to vector<1x8xf32>
      %c0_16 = arith.constant 0 : index
      %c0_17 = arith.constant 0 : index
      %24 = vector.load %arg6[%c0_16, %c0_17] : memref<1x8xf32, #tpu.memory_space<vmem>>, vector<1x8xf32>
      tpu.vector_store %arg6[%c0_16, %c0_17], %23 {strides = array<i32>} : memref<1x8xf32, #tpu.memory_space<vmem>>, vector<1x8xf32>,
      %cst_18 = arith.constant 0.000000e+00 : f32
      %25 = vector.broadcast %cst_18 : f32 to vector<1x8xf32>
      %c0_19 = arith.constant 0 : index
      %c0_20 = arith.constant 0 : index
      %26 = vector.load %arg7[%c0_19, %c0_20] : memref<1x8xf32, #tpu.memory_space<vmem>>, vector<1x8xf32>
      tpu.vector_store %arg7[%c0_19, %c0_20], %25 {strides = array<i32>} : memref<1x8xf32, #tpu.memory_space<vmem>>, vector<1x8xf32>,
    } else {
    }
    %c0 = arith.constant 0 : index
    %c0_1 = arith.constant 0 : index
    %3 = vector.load %arg1[%c0, %c0_1] : memref<64x16xbf16, #tpu.memory_space<vmem>>, vector<64x16xbf16>
    %c0_2 = arith.constant 0 : index
    %c0_3 = arith.constant 0 : index
    %4 = vector.load %arg2[%c0_2, %c0_3] : memref<16x32xbf16, #tpu.memory_space<vmem>>, vector<16x32xbf16>
    %cst = arith.constant dense<0.000000e+00> : vector<64x32xf32>
    %5 = tpu.matmul %3, %4, %cst {dimension_numbers = #tpu.dot_dimension_numbers<[1], [0], [0], [1], [0, 0, 1, 1], [], []>} : vector<64x16xbf16>, vector<16x32xbf16>, vector<64x32xf32> -> vector<64x32xf32>
    %c0_4 = arith.constant 0 : index
    %c0_5 = arith.constant 0 : index
    %6 = vector.load %arg3[%c0_4, %c0_5] : memref<1x32xf32, #tpu.memory_space<vmem>>, vector<1x32xf32>
    %7 = vector.broadcast %6 : vector<1x32xf32> to vector<64x32xf32>
    %8 = arith.addf %5, %7 : vector<64x32xf32>
    %cst_6 = arith.constant 0.000000e+00 : f32
    %9 = vector.broadcast %cst_6 : f32 to vector<64x32xf32>
    %10 = arith.maximumf %8, %9 : vector<64x32xf32>
    %11 = arith.truncf %10 : vector<64x32xf32> to vector<64x32xbf16>
    %c0_7 = arith.constant 0 : index
    %c0_8 = arith.constant 0 : index
    %12 = vector.load %arg4[%c0_7, %c0_8] : memref<32x8xbf16, #tpu.memory_space<vmem>>, vector<32x8xbf16>
    %cst_9 = arith.constant dense<0.000000e+00> : vector<64x8xf32>
    %13 = tpu.matmul %11, %12, %cst_9 {dimension_numbers = #tpu.dot_dimension_numbers<[1], [0], [0], [1], [0, 0, 1, 1], [], []>} : vector<64x32xbf16>, vector<32x8xbf16>, vector<64x8xf32> -> vector<64x8xf32>
    %c0_10 = arith.constant 0 : index
    %c0_11 = arith.constant 0 : index
    %14 = vector.load %arg5[%c0_10, %c0_11] : memref<1x8xf32, #tpu.memory_space<vmem>>, vector<1x8xf32>
    %15 = vector.broadcast %14 : vector<1x8xf32> to vector<64x8xf32>
    %16 = arith.addf %13, %15 : vector<64x8xf32>
    %c3_i32 = arith.constant 3 : i32
    %17 = arith.cmpi ne, %arg0, %c3_i32 : i32
    %18 = arith.extui %17 : i1 to i32
    %c0_i32_12 = arith.constant 0 : i32
    %19 = arith.cmpi ne, %18, %c0_i32_12 : i32
    scf.if %19 {
      %c0_15 = arith.constant 0 : index
      %c0_16 = arith.constant 0 : index
      %23 = vector.load %arg6[%c0_15, %c0_16] : memref<1x8xf32, #tpu.memory_space<vmem>>, vector<1x8xf32>
      %cst_17 = arith.constant dense<0xFF800000> : vector<8xf32>
      %24 = vector.multi_reduction <maximumf>, %16, %cst_17 [0] : vector<64x8xf32> to vector<8xf32>
      %25 = vector.shape_cast %24 : vector<8xf32> to vector<1x8xf32>
      %26 = arith.maximumf %23, %25 : vector<1x8xf32>
      %c0_18 = arith.constant 0 : index
      %c0_19 = arith.constant 0 : index
      %27 = vector.load %arg7[%c0_18, %c0_19] : memref<1x8xf32, #tpu.memory_space<vmem>>, vector<1x8xf32>
      %28 = arith.subf %23, %26 : vector<1x8xf32>
      %29 = math.exp %28 : vector<1x8xf32>
      %30 = arith.mulf %27, %29 : vector<1x8xf32>
      %31 = vector.broadcast %26 : vector<1x8xf32> to vector<64x8xf32>
      %32 = arith.subf %16, %31 : vector<64x8xf32>
      %33 = math.exp %32 : vector<64x8xf32>
      %cst_20 = arith.constant dense<0.000000e+00> : vector<8xf32>
      %34 = vector.multi_reduction <add>, %33, %cst_20 [0] : vector<64x8xf32> to vector<8xf32>
      %35 = vector.shape_cast %34 : vector<8xf32> to vector<1x8xf32>
      %36 = arith.addf %30, %35 : vector<1x8xf32>
      %c0_21 = arith.constant 0 : index
      %c0_22 = arith.constant 0 : index
      %37 = vector.load %arg7[%c0_21, %c0_22] : memref<1x8xf32, #tpu.memory_space<vmem>>, vector<1x8xf32>
      tpu.vector_store %arg7[%c0_21, %c0_22], %36 {strides = array<i32>} : memref<1x8xf32, #tpu.memory_space<vmem>>, vector<1x8xf32>,
      %c0_23 = arith.constant 0 : index
      %c0_24 = arith.constant 0 : index
      %38 = vector.load %arg6[%c0_23, %c0_24] : memref<1x8xf32, #tpu.memory_space<vmem>>, vector<1x8xf32>
      tpu.vector_store %arg6[%c0_23, %c0_24], %26 {strides = array<i32>} : memref<1x8xf32, #tpu.memory_space<vmem>>, vector<1x8xf32>,
    } else {
    }
    %c3_i32_13 = arith.constant 3 : i32
    %20 = arith.cmpi eq, %arg0, %c3_i32_13 : i32
    %21 = arith.extui %20 : i1 to i32
    %c0_i32_14 = arith.constant 0 : i32
    %22 = arith.cmpi ne, %21, %c0_i32_14 : i32
    scf.if %22 {
      %c64_i32 = arith.constant 64 : i32
      %23 = arith.muli %arg0, %c64_i32 : i32
      %24 = tpu.iota {dimensions = array<i32: 0>} : vector<64x8xi32>
      %25 = vector.broadcast %23 : i32 to vector<64x8xi32>
      %26 = arith.addi %25, %24 : vector<64x8xi32>
      %c200_i32 = arith.constant 200 : i32
      %27 = vector.broadcast %c200_i32 : i32 to vector<64x8xi32>
      %28 = arith.cmpi slt, %26, %27 : vector<64x8xi32>
      %cst_15 = arith.constant 0xFF800000 : f32
      %29 = vector.broadcast %cst_15 : f32 to vector<64x8xf32>
      %30 = arith.select %28, %16, %29 : vector<64x8xi1>, vector<64x8xf32>
      %c0_16 = arith.constant 0 : index
      %c0_17 = arith.constant 0 : index
      %31 = vector.load %arg6[%c0_16, %c0_17] : memref<1x8xf32, #tpu.memory_space<vmem>>, vector<1x8xf32>
      %cst_18 = arith.constant dense<0xFF800000> : vector<8xf32>
      %32 = vector.multi_reduction <maximumf>, %30, %cst_18 [0] : vector<64x8xf32> to vector<8xf32>
      %33 = vector.shape_cast %32 : vector<8xf32> to vector<1x8xf32>
      %34 = arith.maximumf %31, %33 : vector<1x8xf32>
      %c0_19 = arith.constant 0 : index
      %c0_20 = arith.constant 0 : index
      %35 = vector.load %arg7[%c0_19, %c0_20] : memref<1x8xf32, #tpu.memory_space<vmem>>, vector<1x8xf32>
      %36 = arith.subf %31, %34 : vector<1x8xf32>
      %37 = math.exp %36 : vector<1x8xf32>
      %38 = arith.mulf %35, %37 : vector<1x8xf32>
      %39 = vector.broadcast %34 : vector<1x8xf32> to vector<64x8xf32>
      %40 = arith.subf %30, %39 : vector<64x8xf32>
      %41 = math.exp %40 : vector<64x8xf32>
      %cst_21 = arith.constant dense<0.000000e+00> : vector<8xf32>
      %42 = vector.multi_reduction <add>, %41, %cst_21 [0] : vector<64x8xf32> to vector<8xf32>
      %43 = vector.shape_cast %42 : vector<8xf32> to vector<1x8xf32>
      %44 = arith.addf %38, %43 : vector<1x8xf32>
      %c0_22 = arith.constant 0 : index
      %c0_23 = arith.constant 0 : index
      %45 = vector.load %arg7[%c0_22, %c0_23] : memref<1x8xf32, #tpu.memory_space<vmem>>, vector<1x8xf32>
      tpu.vector_store %arg7[%c0_22, %c0_23], %44 {strides = array<i32>} : memref<1x8xf32, #tpu.memory_space<vmem>>, vector<1x8xf32>,
      %c0_24 = arith.constant 0 : index
      %c0_25 = arith.constant 0 : index
      %46 = vector.load %arg6[%c0_24, %c0_25] : memref<1x8xf32, #tpu.memory_space<vmem>>, vector<1x8xf32>
      tpu.vector_store %arg6[%c0_24, %c0_25], %34 {strides = array<i32>} : memref<1x8xf32, #tpu.memory_space<vmem>>, vector<1x8xf32>,
    } else {
    }
    return
  }
  func.func @transform_0(%arg0: i32) -> (i32, i32) {
    %c0_i32 = arith.constant 0 : i32
    %c0_i32_0 = arith.constant 0 : i32
    return %arg0, %c0_i32 : i32, i32
  }
  func.func @transform_1(%arg0: i32) -> (i32, i32) {
    %c0_i32 = arith.constant 0 : i32
    %c0_i32_0 = arith.constant 0 : i32
    %c0_i32_1 = arith.constant 0 : i32
    return %c0_i32, %c0_i32_0 : i32, i32
  }
  func.func @transform_2(%arg0: i32) -> (i32, i32) {
    %c0_i32 = arith.constant 0 : i32
    %c0_i32_0 = arith.constant 0 : i32
    %c0_i32_1 = arith.constant 0 : i32
    return %c0_i32, %c0_i32_0 : i32, i32
  }
  func.func @transform_3(%arg0: i32) -> (i32, i32) {
    %c0_i32 = arith.constant 0 : i32
    %c0_i32_0 = arith.constant 0 : i32
    %c0_i32_1 = arith.constant 0 : i32
    return %c0_i32, %c0_i32_0 : i32, i32
  }
  func.func @transform_4(%arg0: i32) -> (i32, i32) {
    %c0_i32 = arith.constant 0 : i32
    %c0_i32_0 = arith.constant 0 : i32
    %c0_i32_1 = arith.constant 0 : i32
    return %c0_i32, %c0_i32_0 : i32, i32
  }
  func.func @transform_5(%arg0: i32) -> (i32, i32) {
    %c0_i32 = arith.constant 0 : i32
    %c0_i32_0 = arith.constant 0 : i32
    %c0_i32_1 = arith.constant 0 : i32
    return %c0_i32, %c0_i32_0 : i32, i32
  }
  func.func @transform_6(%arg0: i32) -> (i32, i32) {
    %c0_i32 = arith.constant 0 : i32
    %c0_i32_0 = arith.constant 0 : i32
    %c0_i32_1 = arith.constant 0 : i32
    return %c0_i32, %c0_i32_0 : i32, i32
  }
}

</mosaic_0001>

<bundles_post_ra>
// kernel: tpu_custom_call.1
= control target key start
LH: loop header
LB: loop body
LE: loop exit
PB: predicated region body
PF: predicated region fallthrough
CT: control target
= control target key end

     0   :  { %12 = vsyncpa [#allocation3], 0  ;;  %s1051_s0 = inlined_call_operand.vmem [shape: bf16[256,16], index: 0, kind: input, shape index: {}]   ;;  %s1052_s1 = inlined_call_operand.vmem [shape: bf16[16,32], index: 1, kind: input, shape index: {}]   ;;  %s1053_s2 = inlined_call_operand.vmem [shape: f32[1,32], index: 2, kind: input, shape index: {}]   ;;  %s1054_s3 = inlined_call_operand.vmem [shape: bf16[32,8], index: 3, kind: input, shape index: {}]   ;;  %s1055_s4 = inlined_call_operand.vmem [shape: f32[1,8], index: 4, kind: input, shape index: {}]   ;;  %s1056_s5 = inlined_call_operand.hbm [shape: f32[1,8], index: 5, kind: output, shape index: {0}]   ;;  %s1057_s6 = inlined_call_operand.hbm [shape: f32[1,8], index: 6, kind: output, shape index: {1}]  }
   0x1   :  { %13 = vsyncpa [#allocation5], 0  ;;  %s915_s21 = smov 0  }
   0x2 LB: > { %s921_s22 = sadd.s32 4294967295, %s874_s21   ;;  %p683_p0 = scmp.ge.s32.totalorder %s874_s21, 1  ;;  %s874_s21 = sphi %s915_s21, %s19_s21  }
   0x3   : > { %p208_p1 = scmp.lt.s32.totalorder %s874_s21, 5 }
   0x5   : > { %p209_p2 = pnand %p683_p0, %p208_p1 }
   0x6   : > { %s684_s23 = sshll.u32 (!%p209_p2), %s921_s22, 3  ;;  %p686_p4 = scmp.ne.s32.totalorder (!%p209_p2), %s921_s22, 0 }
   0x7   : > { %212 = sbr.rel (%p209_p2) target bundleno = 504 (0x1f8), region = 40  ;;  %p234_p3 = scmp.lt.s32.totalorder (!%p209_p2), %s684_s23, 31 }
   0xc   : > { %s1059_s23 = smov (!%p234_p3, %s684_s23), 31  ;;  %243 = sbr.rel (%p686_p4) target bundleno = 20 (0x14), region = 44 }
   0xd   : > { %s685_s24 = sshll.u32 %s1059_s23, 2 }
   0xe   : > { %s237_s27 = scalar_lea.vmem %s1051_s0, %s685_s24 }
  0x11   : > { %vm244_vm0 = vcmask 57344   ;;  %v876_v0 = vmov -inf   ;;  %v877_v1 = vmov 0.0  }
  0x12   : > { %245 = vst.msk [vmem:[#allocation2] sm:$0x1] %vm244_vm0, %v876_v0 }
  0x13   : > { %246 = vst.msk [vmem:[#allocation4] sm:$0x1] %vm244_vm0, %v877_v1 }
  0x14 PF: > { %v736_v2 = vld [vmem:[%s1052_s1] sm:$0xff]  ;;  %v733_v4 = vld [vmem:[%s237_s27 + $0x8] sm:$0xff]  ;;  %vm287_vm1 = vcmask 130048   ;;  %v734_v5 = vld [vmem:[%s237_s27 + $0x10] sm:$0xff]  ;;  %vm361_vm2 = vcmask 261120   ;;  %p723_p5 = scmp.eq.s32.totalorder %s921_s22, 3 }
  0x15   : > { %v732_v3 = vld [vmem:[%s237_s27] sm:$0xff]  ;;  %307 = vmatpush.bf16.msra.mxu0 %v736_v2  ;;  %739 = vmatpush.bf16.msra.mxu3 %v736_v2  ;;  %v735_v6 = vld [vmem:[%s237_s27 + $0x18] sm:$0xff]  ;;  %v738_v7 = vld [vmem:[%s1054_s3 + $0x8] sm:$0xff] }
  0x16   : > { %380 = vmatpush.bf16.msra.mxu1 %v738_v7  ;;  %740 = vmatpush.bf16.msra.mxu2 %v738_v7  ;;  %v737_v8 = vld [vmem:[%s1054_s3] sm:$0xff] }
  0x17   : > { %v766_v10 = vld [vmem:[%s1053_s2] ss:$0 sm:$0xff] }
  0x18   : > { %707 = vmatmul.msk.bf16.vlgmr.msra.gmra.mxu0 %vm287_vm1, %v732_v3  ;;  %708 = vmatmul.msk.bf16.vlgmr.msra.gmra.mxu3 %vm287_vm1, %v733_v4  ;;  %v767_v38 = vld [vmem:[%s1055_s4] ss:$0 sm:$0xff] }
  0x1a   : > { %381 = vmatpush.bf16.msra.mxu1 %v737_v8  ;;  %741 = vmatpush.bf16.msra.mxu2 %v737_v8 }
  0x28   : > { %709 = vmatmul.msk.bf16.gmra.mxu3 %vm287_vm1, %v734_v5 }
  0x38   : > { %710 = vmatmul.msk.bf16.gmra.mxu3 %vm287_vm1, %v735_v6 }
  0x95   : > { %v309_v9 = vpop.f32.mrf.mxu0 }
  0x96   : > { %v310_v11 = vadd.f32 %v766_v10, %v309_v9 }
  0x98   : > { %v329_v14 = vmax.f32 %v310_v11, 0.0 }
  0x9b   : > { %v314_v12 = vpop.f32.mrf.mxu3 }
  0x9c   : > { %v315_v21 = vadd.f32 %v766_v10, %v314_v12 }
  0x9d   : > { %v311_v13 = vpop.f32.mrf.mxu0 }
  0x9e   : > { %v312_v15 = vadd.f32 %v766_v10, %v311_v13  ;;  %v331_v23 = vmax.f32 %v315_v21, 0.0 }
  0xa0   : > { %v330_v16 = vmax.f32 %v312_v15, 0.0 }
  0xa2   : > { %v337_v17 = vpack.c.bf16 %v330_v16, %v329_v14 }
  0xa3   : > { %v316_v18 = vpop.f32.mrf.mxu3 }
  0xa4   : > { %719 = vmatmul.msk.bf16.vlgmr.msra.gmra.mxu1 %vm361_vm2, %v337_v17  ;;  %v317_v19 = vadd.f32 %v766_v10, %v316_v18 }
  0xa6   : > { %v332_v22 = vmax.f32 %v317_v19, 0.0 }
  0xa8   : > { %v338_v24 = vpack.c.bf16 %v332_v22, %v331_v23 }
  0xab   : > { %v319_v20 = vpop.f32.mrf.mxu3 }
  0xac   : > { %v320_v25 = vadd.f32 %v766_v10, %v319_v20 }
  0xae   : > { %v333_v28 = vmax.f32 %v320_v25, 0.0 }
  0xb3   : > { %v321_v26 = vpop.f32.mrf.mxu3 }
  0xb4   : > { %v322_v27 = vadd.f32 %v766_v10, %v321_v26  ;;  %720 = vmatmul.msk.bf16.gmra.mxu1 %vm361_vm2, %v338_v24 }
  0xb6   : > { %v334_v29 = vmax.f32 %v322_v27, 0.0 }
  0xb8   : > { %v339_v30 = vpack.c.bf16 %v334_v29, %v333_v28 }
  0xba   : > { %721 = vmatmul.msk.bf16.vlgmr.msra.gmra.mxu2 %vm361_vm2, %v339_v30 }
  0xbb   : > { %v324_v31 = vpop.f32.mrf.mxu3 }
  0xbc   : > { %v325_v32 = vadd.f32 %v766_v10, %v324_v31 }
  0xbe   : > { %v335_v35 = vmax.f32 %v325_v32, 0.0 }
  0xc3   : > { %v326_v33 = vpop.f32.mrf.mxu3 }
  0xc4   : > { %v327_v34 = vadd.f32 %v766_v10, %v326_v33 }
  0xc6   : > { %v336_v36 = vmax.f32 %v327_v34, 0.0 }
  0xc8   : > { %v340_v37 = vpack.c.bf16 %v336_v36, %v335_v35 }
  0xca   : > { %722 = vmatmul.msk.bf16.gmra.mxu2 %vm361_vm2, %v340_v37 }
 0x121   : > { %v383_v39 = vpop.f32.mrf.mxu1 }
 0x122   : > { %v949_v40 = vadd.f32 %v767_v38, %v383_v39 }
 0x129   : > { %v385_v41 = vpop.f32.mrf.mxu1 }
 0x12a   : > { %v951_v42 = vadd.f32 %v767_v38, %v385_v41 }
 0x131   : > { %v388_v43 = vpop.f32.mrf.mxu1 }
 0x132   : > { %v953_v44 = vadd.f32 %v767_v38, %v388_v43 }
 0x139   : > { %v390_v45 = vpop.f32.mrf.mxu1 }
 0x13a   : > { %v955_v46 = vadd.f32 %v767_v38, %v390_v45 }
 0x13d   : > { %v393_v47 = vpop.f32.mrf.mxu2 }
 0x13e   : > { %v957_v48 = vadd.f32 %v767_v38, %v393_v47 }
 0x145   : > { %v395_v49 = vpop.f32.mrf.mxu2 }
 0x146   : > { %v959_v50 = vadd.f32 %v767_v38, %v395_v49 }
 0x14d   : > { %v398_v51 = vpop.f32.mrf.mxu2 }
 0x14e   : > { %v961_v52 = vadd.f32 %v767_v38, %v398_v51 }
 0x152   : > { %406 = sbr.rel (%p723_p5) target bundleno = 410 (0x19a), region = 48 }
 0x155   : > { %v400_v53 = vpop.f32.mrf.mxu2 }
 0x156   : > { %v963_v54 = vadd.f32 %v767_v38, %v400_v53 }
 0x157   : > { %vm408_vm3 = vcmask 64512   ;;  %v407_v11 = vld [vmem:[#allocation2] sm:$0x1]  ;;  %vm485_vm4 = vcmask 57344  }
 0x158   : > { %v409_v55 = vsel %vm408_vm3, %v949_v40, -inf  ;;  %v410_v56 = vsel %vm408_vm3, %v951_v42, -inf  ;;  %v411_v57 = vsel %vm408_vm3, %v953_v44, -inf  ;;  %v412_v58 = vsel %vm408_vm3, %v955_v46, -inf }
 0x159   : > { %v413_v59 = vsel %vm408_vm3, %v957_v48, -inf  ;;  %v415_v60 = vsel %vm408_vm3, %v959_v50, -inf  ;;  %v417_v61 = vsel %vm408_vm3, %v961_v52, -inf  ;;  %v419_v62 = vsel %vm408_vm3, %v963_v54, -inf }
 0x15a   : > { %v414_v63 = vmax.f32 %v409_v55, %v413_v59  ;;  %v416_v0 = vmax.f32 %v410_v56, %v415_v60  ;;  %v418_v1 = vmax.f32 %v411_v57, %v417_v61  ;;  %v420_v2 = vmax.f32 %v412_v58, %v419_v62 }
 0x15c   : > { %v421_v3 = vmax.f32 %v414_v63, %v416_v0  ;;  %v422_v4 = vmax.f32 %v418_v1, %v420_v2 }
 0x15e   : > { %v423_v5 = vmax.f32 %v421_v3, %v422_v4  ;;  %v431_v4 = vld [vmem:[#allocation4] sm:$0x1] }
 0x160   : > { %v424_v6 = vrot.slane %v423_v5, 4 }
 0x162   : > { %v425_v7 = vmax.f32 %v423_v5, %v424_v6 }
 0x164   : > { %v426_v8 = vrot.slane %v425_v7, 2 }
 0x166   : > { %v427_v9 = vmax.f32 %v425_v7, %v426_v8 }
 0x168   : > { %v428_v10 = vrot.slane %v427_v9, 1 }
 0x16a   : > { %v429_v12 = vmax.f32 %v427_v9, %v428_v10 }
 0x16c   : > { %v430_v13 = vmax.f32 %v407_v11, %v429_v12 }
 0x16e   : > { %v437_v14 = vperm.slane %v430_v13, 0  ;;  %487 = vst.msk [vmem:[#allocation2] sm:$0x1] %vm485_vm4, %v430_v13  ;;  %v432_v53 = vsub.f32 %v407_v11, %v430_v13 }
 0x170   : > { %v439_v15 = vsub.f32 %v949_v40, %v437_v14  ;;  %v440_v16 = vsub.f32 %v951_v42, %v437_v14  ;;  %v441_v17 = vsub.f32 %v953_v44, %v437_v14  ;;  %v442_v18 = vsub.f32 %v955_v46, %v437_v14 }
 0x171   : > { %v443_v19 = vsub.f32 %v957_v48, %v437_v14  ;;  %v444_v20 = vsub.f32 %v959_v50, %v437_v14  ;;  %v445_v23 = vsub.f32 %v961_v52, %v437_v14  ;;  %v446_v27 = vsub.f32 %v963_v54, %v437_v14 }
 0x172   : > { %v447_v21 = vmul.f32 1.442695, %v439_v15  ;;  %v449_v22 = vmul.f32 1.442695, %v440_v16  ;;  %v451_v24 = vmul.f32 1.442695, %v441_v17 }
 0x173   : > { %v453_v25 = vmul.f32 1.442695, %v442_v18  ;;  %v455_v26 = vmul.f32 1.442695, %v443_v19  ;;  %v457_v28 = vmul.f32 1.442695, %v444_v20 }
 0x174   : > { %768 = vpow2.f32 %v447_v21  ;;  %v459_v29 = vmul.f32 1.442695, %v445_v23  ;;  %v461_v30 = vmul.f32 1.442695, %v446_v27  ;;  %v433_v60 = vmul.f32 1.442695, %v432_v53 }
 0x175   : > { %770 = vpow2.f32 %v449_v22 }
 0x176   : > { %772 = vpow2.f32 %v451_v24 }
 0x177   : > { %774 = vpow2.f32 %v453_v25 }
 0x178   : > { %776 = vpow2.f32 %v455_v26 }
 0x179   : > { %778 = vpow2.f32 %v457_v28 }
 0x17a   : > { %v769_v31 = vpop.eup %768  ;;  %780 = vpow2.f32 %v459_v29 }
 0x17b   : > { %v771_v32 = vpop.eup %770  ;;  %v463_v33 = vsel %vm408_vm3, %v769_v31, 0.0  ;;  %782 = vpow2.f32 %v461_v30 }
 0x17c   : > { %v773_v34 = vpop.eup %772  ;;  %v464_v35 = vsel %vm408_vm3, %v771_v32, 0.0  ;;  %784 = vpow2.f32 %v433_v60 }
 0x17d   : > { %v775_v36 = vpop.eup %774  ;;  %v465_v37 = vadd.f32 %v464_v35, %v463_v33  ;;  %v466_v38 = vsel %vm408_vm3, %v773_v34, 0.0 }
 0x17e   : > { %v777_v39 = vpop.eup %776  ;;  %v468_v41 = vsel %vm408_vm3, %v775_v36, 0.0 }
 0x17f   : > { %v779_v43 = vpop.eup %778  ;;  %v467_v45 = vadd.f32 %v466_v38, %v465_v37  ;;  %v470_v47 = vsel %vm408_vm3, %v777_v39, 0.0 }
 0x180   : > { %v781_v49 = vpop.eup %780  ;;  %v472_v55 = vsel %vm408_vm3, %v779_v43, 0.0 }
 0x181   : > { %v469_v51 = vadd.f32 %v468_v41, %v467_v45  ;;  %v783_v56 = vpop.eup %782  ;;  %v474_v58 = vsel %vm408_vm3, %v781_v49, 0.0 }
 0x182   : > { %v476_v61 = vsel %vm408_vm3, %v783_v56, 0.0  ;;  %v785_v3 = vpop.eup %784 }
 0x183   : > { %v471_v57 = vadd.f32 %v470_v47, %v469_v51  ;;  %v435_v6 = vmul.f32 %v785_v3, %v431_v4 }
 0x185   : > { %v473_v59 = vadd.f32 %v472_v55, %v471_v57 }
 0x187   : > { %v475_v62 = vadd.f32 %v474_v58, %v473_v59 }
 0x189   : > { %v477_v63 = vadd.f32 %v476_v61, %v475_v62 }
 0x18b   : > { %v478_v0 = vrot.slane %v477_v63, 4 }
 0x18d   : > { %v479_v1 = vadd.f32 %v478_v0, %v477_v63 }
 0x18f   : > { %v480_v2 = vrot.slane %v479_v1, 2 }
 0x191   : > { %v481_v5 = vadd.f32 %v480_v2, %v479_v1 }
 0x193   : > { %v482_v7 = vrot.slane %v481_v5, 1 }
 0x195   : > { %v483_v8 = vadd.f32 %v482_v7, %v481_v5 }
 0x197   : > { %v484_v9 = vadd.f32 %v483_v8, %v435_v6 }
 0x199   : > { %486 = vst.msk [vmem:[#allocation4] sm:$0x1] %vm485_vm4, %v484_v9 }
 0x19a PF: > { %p724_p6 = scmp.ne.s32.totalorder %s921_s22, 3 }
 0x19b   : > { %s725_s14 = sshll.u32 (!%p724_p6), %s921_s22, 6 }
 0x19c   : > { %491 = sbr.rel (%p724_p6) target bundleno = 495 (0x1ef), region = 52 }
 0x1a1   : > { %v493_v10 = vlaneseq  ;;  %v502_v12 = vstv %s725_s14  ;;  %vm528_vm5 = vcmask 64512   ;;  %v527_v56 = vld [vmem:[#allocation2] sm:$0x1]  ;;  %vm605_vm14 = vcmask 57344  }
 0x1a3   : > { %v494_v11 = vshrl.u32 %v493_v10, 7 }
 0x1a5   : > { %v495_v13 = vadd.s32 8, %v494_v11  ;;  %v496_v14 = vadd.s32 16, %v494_v11  ;;  %v497_v15 = vadd.s32 24, %v494_v11  ;;  %v498_v16 = vadd.s32 32, %v494_v11 }
 0x1a6   : > { %v499_v17 = vadd.s32 40, %v494_v11  ;;  %v500_v18 = vadd.s32 48, %v494_v11  ;;  %v501_v19 = vadd.s32 56, %v494_v11  ;;  %v503_v20 = vadd.s32 %v502_v12, %v494_v11 }
 0x1a7   : > { %v504_v21 = vadd.s32 %v502_v12, %v495_v13  ;;  %v505_v22 = vadd.s32 %v502_v12, %v496_v14  ;;  %v506_v23 = vadd.s32 %v502_v12, %v497_v15  ;;  %v507_v24 = vadd.s32 %v502_v12, %v498_v16 }
 0x1a8   : > { %v508_v25 = vadd.s32 %v502_v12, %v499_v17  ;;  %v509_v26 = vadd.s32 %v502_v12, %v500_v18  ;;  %v510_v27 = vadd.s32 %v502_v12, %v501_v19  ;;  %vm511_vm6 = vcmp.lt.s32.totalorder %v503_v20, 200 }
 0x1a9   : > { %vm512_vm7 = vcmp.lt.s32.totalorder %v504_v21, 200  ;;  %vm513_vm8 = vcmp.lt.s32.totalorder %v505_v22, 200  ;;  %vm514_vm9 = vcmp.lt.s32.totalorder %v506_v23, 200  ;;  %vm515_vm10 = vcmp.lt.s32.totalorder %v507_v24, 200 }
 0x1aa   : > { %vm516_vm11 = vcmp.lt.s32.totalorder %v508_v25, 200  ;;  %vm517_vm12 = vcmp.lt.s32.totalorder %v509_v26, 200  ;;  %vm518_vm13 = vcmp.lt.s32.totalorder %v510_v27, 200  ;;  %v519_v28 = vsel %vm511_vm6, %v949_v40, -inf }
 0x1ab   : > { %v520_v29 = vsel %vm512_vm7, %v951_v42, -inf  ;;  %v521_v30 = vsel %vm513_vm8, %v953_v44, -inf  ;;  %v522_v31 = vsel %vm514_vm9, %v955_v46, -inf  ;;  %v523_v32 = vsel %vm515_vm10, %v957_v48, -inf }
 0x1ac   : > { %v524_v33 = vsel %vm516_vm11, %v959_v50, -inf  ;;  %v525_v34 = vsel %vm517_vm12, %v961_v52, -inf  ;;  %v526_v35 = vsel %vm518_vm13, %v963_v54, -inf  ;;  %v529_v36 = vsel %vm528_vm5, %v519_v28, -inf }
 0x1ad   : > { %v530_v37 = vsel %vm528_vm5, %v520_v29, -inf  ;;  %v531_v40 = vsel %vm528_vm5, %v521_v30, -inf  ;;  %v532_v42 = vsel %vm528_vm5, %v522_v31, -inf  ;;  %v533_v44 = vsel %vm528_vm5, %v523_v32, -inf }
 0x1ae   : > { %v534_v38 = vmax.f32 %v529_v36, %v533_v44  ;;  %v535_v46 = vsel %vm528_vm5, %v524_v33, -inf  ;;  %v537_v48 = vsel %vm528_vm5, %v525_v34, -inf  ;;  %v539_v50 = vsel %vm528_vm5, %v526_v35, -inf }
 0x1af   : > { %v536_v52 = vmax.f32 %v530_v37, %v535_v46  ;;  %v538_v39 = vmax.f32 %v531_v40, %v537_v48  ;;  %v540_v54 = vmax.f32 %v532_v42, %v539_v50 }
 0x1b1   : > { %v541_v41 = vmax.f32 %v534_v38, %v536_v52  ;;  %v542_v43 = vmax.f32 %v538_v39, %v540_v54  ;;  %v551_v38 = vld [vmem:[#allocation4] sm:$0x1] }
 0x1b3   : > { %v543_v45 = vmax.f32 %v541_v41, %v542_v43 }
 0x1b5   : > { %v544_v47 = vrot.slane %v543_v45, 4 }
 0x1b7   : > { %v545_v49 = vmax.f32 %v543_v45, %v544_v47 }
 0x1b9   : > { %v546_v51 = vrot.slane %v545_v49, 2 }
 0x1bb   : > { %v547_v53 = vmax.f32 %v545_v49, %v546_v51 }
 0x1bd   : > { %v548_v55 = vrot.slane %v547_v53, 1 }
 0x1bf   : > { %v549_v57 = vmax.f32 %v547_v53, %v548_v55 }
 0x1c1   : > { %v550_v58 = vmax.f32 %v527_v56, %v549_v57 }
 0x1c3   : > { %v557_v59 = vperm.slane %v550_v58, 0  ;;  %607 = vst.msk [vmem:[#allocation2] sm:$0x1] %vm605_vm14, %v550_v58  ;;  %v552_v27 = vsub.f32 %v527_v56, %v550_v58 }
 0x1c5   : > { %v559_v60 = vsub.f32 %v519_v28, %v557_v59  ;;  %v560_v61 = vsub.f32 %v520_v29, %v557_v59  ;;  %v561_v62 = vsub.f32 %v521_v30, %v557_v59  ;;  %v562_v63 = vsub.f32 %v522_v31, %v557_v59 }
 0x1c6   : > { %v563_v0 = vsub.f32 %v523_v32, %v557_v59  ;;  %v564_v1 = vsub.f32 %v524_v33, %v557_v59  ;;  %v565_v4 = vsub.f32 %v525_v34, %v557_v59  ;;  %v566_v8 = vsub.f32 %v526_v35, %v557_v59 }
 0x1c7   : > { %v567_v2 = vmul.f32 1.442695, %v559_v60  ;;  %v569_v3 = vmul.f32 1.442695, %v560_v61  ;;  %v571_v5 = vmul.f32 1.442695, %v561_v62 }
 0x1c8   : > { %v573_v6 = vmul.f32 1.442695, %v562_v63  ;;  %v575_v7 = vmul.f32 1.442695, %v563_v0  ;;  %v577_v9 = vmul.f32 1.442695, %v564_v1 }
 0x1c9   : > { %786 = vpow2.f32 %v567_v2  ;;  %v579_v10 = vmul.f32 1.442695, %v565_v4  ;;  %v581_v11 = vmul.f32 1.442695, %v566_v8  ;;  %v553_v33 = vmul.f32 1.442695, %v552_v27 }
 0x1ca   : > { %788 = vpow2.f32 %v569_v3 }
 0x1cb   : > { %790 = vpow2.f32 %v571_v5 }
 0x1cc   : > { %792 = vpow2.f32 %v573_v6 }
 0x1cd   : > { %794 = vpow2.f32 %v575_v7 }
 0x1ce   : > { %796 = vpow2.f32 %v577_v9 }
 0x1cf   : > { %v787_v12 = vpop.eup %786  ;;  %798 = vpow2.f32 %v579_v10 }
 0x1d0   : > { %v789_v13 = vpop.eup %788  ;;  %v583_v14 = vsel %vm528_vm5, %v787_v12, 0.0  ;;  %800 = vpow2.f32 %v581_v11 }
 0x1d1   : > { %v791_v15 = vpop.eup %790  ;;  %v584_v16 = vsel %vm528_vm5, %v789_v13, 0.0  ;;  %802 = vpow2.f32 %v553_v33 }
 0x1d2   : > { %v793_v17 = vpop.eup %792  ;;  %v585_v18 = vadd.f32 %v584_v16, %v583_v14  ;;  %v586_v19 = vsel %vm528_vm5, %v791_v15, 0.0 }
 0x1d3   : > { %v795_v20 = vpop.eup %794  ;;  %v588_v21 = vsel %vm528_vm5, %v793_v17, 0.0 }
 0x1d4   : > { %v797_v22 = vpop.eup %796  ;;  %v587_v23 = vadd.f32 %v586_v19, %v585_v18  ;;  %v590_v24 = vsel %vm528_vm5, %v795_v20, 0.0 }
 0x1d5   : > { %v799_v25 = vpop.eup %798  ;;  %v592_v28 = vsel %vm528_vm5, %v797_v22, 0.0 }
 0x1d6   : > { %v589_v26 = vadd.f32 %v588_v21, %v587_v23  ;;  %v801_v29 = vpop.eup %800  ;;  %v594_v31 = vsel %vm528_vm5, %v799_v25, 0.0 }
 0x1d7   : > { %v596_v34 = vsel %vm528_vm5, %v801_v29, 0.0  ;;  %v803_v44 = vpop.eup %802 }
 0x1d8   : > { %v591_v30 = vadd.f32 %v590_v24, %v589_v26  ;;  %v555_v48 = vmul.f32 %v803_v44, %v551_v38 }
 0x1da   : > { %v593_v32 = vadd.f32 %v592_v28, %v591_v30 }
 0x1dc   : > { %v595_v35 = vadd.f32 %v594_v31, %v593_v32 }
 0x1de   : > { %v597_v36 = vadd.f32 %v596_v34, %v595_v35 }
 0x1e0   : > { %v598_v37 = vrot.slane %v597_v36, 4 }
 0x1e2   : > { %v599_v40 = vadd.f32 %v598_v37, %v597_v36 }
 0x1e4   : > { %v600_v42 = vrot.slane %v599_v40, 2 }
 0x1e6   : > { %v601_v46 = vadd.f32 %v600_v42, %v599_v40 }
 0x1e8   : > { %v602_v50 = vrot.slane %v601_v46, 1 }
 0x1ea   : > { %v603_v52 = vadd.f32 %v602_v50, %v601_v46 }
 0x1ec   : > { %v604_v39 = vadd.f32 %v603_v52, %v555_v48 }
 0x1ee   : > { %606 = vst.msk [vmem:[#allocation4] sm:$0x1] %vm605_vm14, %v604_v39 }
 0x1ef PF: > { %s616_s17 = sshll.u32 %s1056_s5, 4  ;;  %s878_s18 = smov [#allocation2]   ;;  %s617_s17 = int_to_ptr.hbm [resolvable:$true] %s616_s17 }
 0x1f0   : > { %s614_s19 = sshll.u32 %s878_s18, 4  ;;  %s879_s20 = smov [#allocation4]   ;;  %s615_s19 = int_to_ptr.vmem [resolvable:$true] %s614_s19 }
 0x1f1   : > { %743 = dma.vmem_to_hbm [thread:$0]  (%p723_p5), %s615_s19, 16, %s617_s17, [#allocation3]  }
 0x1f2   : > { %s626_s23 = sshll.u32 %s879_s20, 4  ;;  %s628_s26 = sshll.u32 %s1057_s6, 4  ;;  %s627_s23 = int_to_ptr.vmem [resolvable:$true] %s626_s23  ;;  %s629_s26 = int_to_ptr.hbm [resolvable:$true] %s628_s26 }
 0x1f3   : > { %745 = dma.vmem_to_hbm [thread:$0]  (%p723_p5), %s627_s23, 16, %s629_s26, [#allocation5]  }
 0x1f4   : > { %865 = dma.done.wait (%p723_p5), [#allocation3], 16  }
 0x1f5   : > { %867 = vsyncadd (%p723_p5), [#allocation3], 4294967280 }
 0x1f6   : > { %869 = dma.done.wait (%p723_p5), [#allocation5], 16  }
 0x1f7   : > { %871 = vsyncadd (%p723_p5), [#allocation5], 4294967280 }
 0x1f8 PF: > { %s19_s21 = sadd.s32 1, %s874_s21  }
 0x1f9   : > { %p16_p7 = scmp.ge.s32.totalorder %s19_s21, 6  }
 0x1fb   :  { %18 = sbr.rel (!%p16_p7) target bundleno = 2 (0x2), region = 87 }
 0x200   :  { %647 = vsyncpa [#allocation3], 1 }
 0x201   :  { %649 = vsyncpa [#allocation3 + $0x1], 1 }
 0x202   :  { %650 = vsyncpa [#allocation5], 1 }

</bundles_post_ra>
